<compile_context>
chip_gen: v7x
topology: tpu7x:2x2x1
jax: 0.10.0
libtpu: 0.0.40
codegen_flags: <defaults>
</compile_context>

<pallas_src>
import functools
import math

import jax
import jax.numpy as jnp
from jax.experimental import pallas as pl
from jax.experimental.pallas import tpu as pltpu

EPS = 1e-5          # nn.LayerNorm default eps
TILE_M = 128        # row tile (large enough to amortize per-step overhead)


def _ln_relu(z, g, beta):
    """LayerNorm (biased var, eps inside sqrt) + affine + ReLU, all in f32."""
    mean = jnp.mean(z, axis=-1, keepdims=True)
    var = jnp.mean((z - mean) ** 2, axis=-1, keepdims=True)
    zn = (z - mean) * jax.lax.rsqrt(var + EPS)
    return jnp.maximum(zn * g + beta, 0.0)


# ----------------------------------------------------------------------------
# Kernel 1: fused node path.
#   h = x; for each node layer: h = ReLU(LN(h @ W + b))
#   x_node = h ; v_out = h @ Wv + bv        (attention output == V exactly,
#   because softmax over a length-1 sequence is identically 1)
# Intermediates stay in VMEM/vregs for the whole row tile.
# ----------------------------------------------------------------------------
def _make_node_kernel(num_layers):
    n_param = 4 * num_layers + 2   # (w,b,gamma,beta) per layer + (wv,bv)

    def kernel(x_ref, *refs):
        params = refs[:n_param]
        xnode_ref = refs[n_param]
        vout_ref = refs[n_param + 1]

        h = x_ref[...]
        for l in range(num_layers):            # static, small layer count
            w, b, g, bt = params[4 * l: 4 * l + 4]
            z = jnp.dot(h, w[...], preferred_element_type=jnp.float32) + b[...]
            h = _ln_relu(z, g[...], bt[...])
        xnode_ref[...] = h.astype(xnode_ref.dtype)

        wv, bv = params[4 * num_layers], params[4 * num_layers + 1]
        v = jnp.dot(h, wv[...], preferred_element_type=jnp.float32) + bv[...]
        vout_ref[...] = v.astype(vout_ref.dtype)

    return kernel


def fused_node_forward(x, node_params, wv, bv, *, tile_m=TILE_M):
    M, Din = x.shape
    assert M % tile_m == 0, "pad rows to a multiple of tile_m before calling"
    num_layers = len(node_params)
    d_node = node_params[-1][0].shape[1]
    dqkv = wv.shape[1]

    in_specs = [pl.BlockSpec((tile_m, Din), lambda i: (i, 0))]
    args = [x]
    for (w, b, g, beta) in node_params:
        din_l, dout_l = w.shape
        in_specs += [
            pl.BlockSpec((din_l, dout_l), lambda i: (0, 0)),   # weight (resident)
            pl.BlockSpec((1, dout_l), lambda i: (0, 0)),       # bias
            pl.BlockSpec((1, dout_l), lambda i: (0, 0)),       # gamma
            pl.BlockSpec((1, dout_l), lambda i: (0, 0)),       # beta
        ]
        args += [w, b.reshape(1, -1), g.reshape(1, -1), beta.reshape(1, -1)]
    in_specs += [
        pl.BlockSpec((d_node, dqkv), lambda i: (0, 0)),        # Wv (resident)
        pl.BlockSpec((1, dqkv), lambda i: (0, 0)),             # bv
    ]
    args += [wv, bv.reshape(1, -1)]

    return pl.pallas_call(
        _make_node_kernel(num_layers),
        out_shape=(jax.ShapeDtypeStruct((M, d_node), jnp.float32),
                   jax.ShapeDtypeStruct((M, dqkv), jnp.float32)),
        grid_spec=pltpu.PrefetchScalarGridSpec(
            num_scalar_prefetch=0,
            grid=(pl.cdiv(M, tile_m),),
            in_specs=in_specs,
            out_specs=(pl.BlockSpec((tile_m, d_node), lambda i: (i, 0)),
                       pl.BlockSpec((tile_m, dqkv), lambda i: (i, 0))),
        ),
        compiler_params=pltpu.CompilerParams(
            dimension_semantics=("parallel",)),   # shards across v7x TCs
    )(*args)


# ----------------------------------------------------------------------------
# Kernel 2: scatter_add over the graph index (segment sum) via one-hot matmul.
# Contraction dim = tile_m = 128; padded rows carry batch=-1 -> zero one-hot.
# ----------------------------------------------------------------------------
def _segment_sum_kernel(batch_ref, v_ref, o_ref, *, num_segments):
    @pl.when(pl.program_id(0) == 0)
    def _():
        o_ref[...] = jnp.zeros_like(o_ref)
    seg = batch_ref[...]                                          # (tile_m, 1) int32
    tile_m = seg.shape[0]
    iota = jax.lax.broadcasted_iota(jnp.int32, (tile_m, num_segments), 1)
    onehot = (seg == iota).astype(jnp.float32)
    o_ref[...] += jax.lax.dot_general(
        onehot, v_ref[...],
        dimension_numbers=(((0,), (0,)), ((), ())),
        preferred_element_type=jnp.float32)


def segment_sum(batch_col, v, *, num_segments, tile_m=TILE_M):
    M, C = v.shape
    assert M % tile_m == 0
    kernel = functools.partial(_segment_sum_kernel, num_segments=num_segments)
    return pl.pallas_call(
        kernel,
        out_shape=jax.ShapeDtypeStruct((num_segments, C), jnp.float32),
        grid_spec=pltpu.PrefetchScalarGridSpec(
            num_scalar_prefetch=0,
            grid=(pl.cdiv(M, tile_m),),
            in_specs=[
                pl.BlockSpec((tile_m, 1), lambda i: (i, 0)),
                pl.BlockSpec((tile_m, C), lambda i: (i, 0)),
            ],
            out_specs=pl.BlockSpec((num_segments, C), lambda i: (0, 0)),
        ),
        compiler_params=pltpu.CompilerParams(dimension_semantics=("arbitrary",)),
    )(batch_col, v)


# ----------------------------------------------------------------------------
# Kernel 3: fused set MLP (all set layers in one call; dropout is identity in
# eval mode).  The set dimension is tiny, so a single grid step suffices.
# ----------------------------------------------------------------------------
def _make_mlp_kernel(num_layers):
    def kernel(*refs):
        x_ref = refs[0]
        o_ref = refs[1 + 4 * num_layers]
        h = x_ref[...]
        for l in range(num_layers):
            w, b, g, bt = refs[1 + 4 * l: 1 + 4 * l + 4]
            z = jnp.dot(h, w[...], preferred_element_type=jnp.float32) + b[...]
            h = _ln_relu(z, g[...], bt[...])
        o_ref[...] = h.astype(o_ref.dtype)
    return kernel


def fused_set_forward(x, set_params):
    B, Din = x.shape
    num_layers = len(set_params)
    d_out = set_params[-1][0].shape[1]

    in_specs = [pl.BlockSpec((B, Din), lambda i: (0, 0))]
    args = [x]
    for (w, b, g, beta) in set_params:
        din_l, dout_l = w.shape
        in_specs += [
            pl.BlockSpec((din_l, dout_l), lambda i: (0, 0)),
            pl.BlockSpec((1, dout_l), lambda i: (0, 0)),
            pl.BlockSpec((1, dout_l), lambda i: (0, 0)),
            pl.BlockSpec((1, dout_l), lambda i: (0, 0)),
        ]
        args += [w, b.reshape(1, -1), g.reshape(1, -1), beta.reshape(1, -1)]

    return pl.pallas_call(
        _make_mlp_kernel(num_layers),
        out_shape=jax.ShapeDtypeStruct((B, d_out), jnp.float32),
        grid_spec=pltpu.PrefetchScalarGridSpec(
            num_scalar_prefetch=0,
            grid=(1,),
            in_specs=in_specs,
            out_specs=pl.BlockSpec((B, d_out), lambda i: (0, 0)),
        ),
        compiler_params=pltpu.CompilerParams(dimension_semantics=("arbitrary",)),
    )(*args)


# ----------------------------------------------------------------------------
# Parameters (deterministic, synthetic — PyTorch-Linear-style uniform init)
# ----------------------------------------------------------------------------
def _linear_init(key, din, dout):
    k1, k2 = jax.random.split(key)
    bound = 1.0 / math.sqrt(din)
    w = jax.random.uniform(k1, (din, dout), jnp.float32, -bound, bound)  # (in, out)
    b = jax.random.uniform(k2, (dout,), jnp.float32, -bound, bound)
    return w, b


def init_params(key, input_dim, node_layers, set_layers, num_heads):
    n_linear = len(node_layers) + len(set_layers) + 3     # + q, k, v
    keys = jax.random.split(key, n_linear)
    params = {"node": [], "set": []}
    ki = 0

    in_dim = input_dim
    for out_dim in node_layers:
        w, b = _linear_init(keys[ki], in_dim, out_dim); ki += 1
        params["node"].append((w, b, jnp.ones((out_dim,), jnp.float32),
                               jnp.zeros((out_dim,), jnp.float32)))
        in_dim = out_dim

    d_attn = node_layers[-1]
    wq, bq = _linear_init(keys[ki], d_attn, d_attn * num_heads); ki += 1
    wk, bk = _linear_init(keys[ki], d_attn, d_attn * num_heads); ki += 1
    wv, bv = _linear_init(keys[ki], d_attn, d_attn * num_heads); ki += 1
    # Q/K weights exist in the module but never affect the output
    # (softmax over a length-1 sequence == 1), so they are stored but unused.
    params["attn_qk"] = (wq, bq, wk, bk)
    params["attn_v"] = (wv, bv)

    in_dim = node_layers[-1] * num_heads                  # is_concat_attention=True
    for out_dim in set_layers:
        w, b = _linear_init(keys[ki], in_dim, out_dim); ki += 1
        params["set"].append((w, b, jnp.ones((out_dim,), jnp.float32),
                              jnp.zeros((out_dim,), jnp.float32)))
        in_dim = out_dim
    return params


# ----------------------------------------------------------------------------
# Forward (glue in plain JAX, compute in the Pallas kernels above)
# ----------------------------------------------------------------------------
def deep_set_transformer_forward(params, x, batch, *, num_heads, num_graphs):
    N, _ = x.shape
    dim_out = params["node"][-1][0].shape[1]              # node_layers[-1]
    wv, bv = params["attn_v"]

    n_pad = pl.cdiv(N, TILE_M) * TILE_M
    x_p = jnp.pad(x, ((0, n_pad - N), (0, 0)))

    # fused: node MLP (Linear->LayerNorm->ReLU per block) + attention V proj
    xnode_p, v_out = fused_node_forward(x_p, params["node"], wv, bv)
    x_node = xnode_p[:N]

    # attention output == V (length-1 sequence softmax is identically 1)
    x_transformed = v_out[:N].reshape(N, num_heads, dim_out)   # torch x_transformed.squeeze(1)
    attn_weights = jnp.ones((num_heads, N, 1, 1), jnp.float32)

    # scatter_add over graph id (concat path: features = num_heads * dim_out)
    b_pad = max(8, ((num_graphs + 7) // 8) * 8)
    batch_p = jnp.pad(batch.astype(jnp.int32), (0, n_pad - N), constant_values=-1)
    x_summed = segment_sum(batch_p.reshape(n_pad, 1), v_out, num_segments=b_pad)

    # fused set MLP (final nn.Dropout is identity in eval mode)
    x_set_p = fused_set_forward(x_summed, params["set"])
    x_set = x_set_p[:num_graphs]                               # == squeeze(1, 2)
    return x_node, x_set, x_transformed, attn_weights


if __name__ == "__main__":
    input_dim = 16
    node_layers = [32, 32]
    set_layers = [32, 16]
    num_heads = 2
    N, num_graphs = 12, 2

    key = jax.random.PRNGKey(0)
    kx, kp = jax.random.split(key)
    x = jax.random.normal(kx, (N, input_dim), jnp.float32)
    batch = jnp.array([0] * 5 + [1] * 7, dtype=jnp.int32)
    params = init_params(kp, input_dim, node_layers, set_layers, num_heads)

    x_node, x_set, x_transformed, attn_weights = deep_set_transformer_forward(
        params, x, batch, num_heads=num_heads, num_graphs=num_graphs)
    jax.block_until_ready((x_node, x_set, x_transformed, attn_weights))

    assert x_node.shape == (N, node_layers[-1])
    assert x_set.shape == (num_graphs, set_layers[-1])
    assert x_transformed.shape == (N, num_heads, node_layers[-1])
    assert attn_weights.shape == (num_heads, N, 1, 1)
    assert bool(jnp.all(jnp.isfinite(x_node)))
    assert bool(jnp.all(jnp.isfinite(x_set)))
    print("KERNEL_OK")
</pallas_src>

<mosaic_0001>
module attributes {stable_mosaic.version = 11 : i64} {
  func.func @kernel(%arg0: i32, %arg1: memref<128x16xf32, #tpu.memory_space<vmem>>, %arg2: memref<16x32xf32, #tpu.memory_space<vmem>>, %arg3: memref<1x32xf32, #tpu.memory_space<vmem>>, %arg4: memref<1x32xf32, #tpu.memory_space<vmem>>, %arg5: memref<1x32xf32, #tpu.memory_space<vmem>>, %arg6: memref<32x32xf32, #tpu.memory_space<vmem>>, %arg7: memref<1x32xf32, #tpu.memory_space<vmem>>, %arg8: memref<1x32xf32, #tpu.memory_space<vmem>>, %arg9: memref<1x32xf32, #tpu.memory_space<vmem>>, %arg10: memref<32x64xf32, #tpu.memory_space<vmem>>, %arg11: memref<1x64xf32, #tpu.memory_space<vmem>>, %arg12: memref<128x32xf32, #tpu.memory_space<vmem>>, %arg13: memref<128x64xf32, #tpu.memory_space<vmem>>) attributes {dimension_semantics = [#tpu.dimension_semantics<parallel>], iteration_bounds = array<i64: 1>, scalar_prefetch = 0 : i64, scratch_operands = 0 : i64, tpu.core_type = #tpu.core_type<tc>, window_params = [{transform_indices = @transform_0, window_bounds = array<i64: 128, 16>}, {pipeline_mode = #tpu.pipeline_mode<synchronous>, transform_indices = @transform_1, window_bounds = array<i64: 16, 32>}, {pipeline_mode = #tpu.pipeline_mode<synchronous>, transform_indices = @transform_2, window_bounds = array<i64: 1, 32>}, {pipeline_mode = #tpu.pipeline_mode<synchronous>, transform_indices = @transform_3, window_bounds = array<i64: 1, 32>}, {pipeline_mode = #tpu.pipeline_mode<synchronous>, transform_indices = @transform_4, window_bounds = array<i64: 1, 32>}, {pipeline_mode = #tpu.pipeline_mode<synchronous>, transform_indices = @transform_5, window_bounds = array<i64: 32, 32>}, {pipeline_mode = #tpu.pipeline_mode<synchronous>, transform_indices = @transform_6, window_bounds = array<i64: 1, 32>}, {pipeline_mode = #tpu.pipeline_mode<synchronous>, transform_indices = @transform_7, window_bounds = array<i64: 1, 32>}, {pipeline_mode = #tpu.pipeline_mode<synchronous>, transform_indices = @transform_8, window_bounds = array<i64: 1, 32>}, {pipeline_mode = #tpu.pipeline_mode<synchronous>, transform_indices = @transform_9, window_bounds = array<i64: 32, 64>}, {pipeline_mode = #tpu.pipeline_mode<synchronous>, transform_indices = @transform_10, window_bounds = array<i64: 1, 64>}, {transform_indices = @transform_11, window_bounds = array<i64: 128, 32>}, {transform_indices = @transform_12, window_bounds = array<i64: 128, 64>}]} {
    %c0 = arith.constant 0 : index
    %c0_0 = arith.constant 0 : index
    %0 = vector.load %arg1[%c0, %c0_0] : memref<128x16xf32, #tpu.memory_space<vmem>>, vector<128x16xf32>
    %c0_1 = arith.constant 0 : index
    %c0_2 = arith.constant 0 : index
    %1 = vector.load %arg2[%c0_1, %c0_2] : memref<16x32xf32, #tpu.memory_space<vmem>>, vector<16x32xf32>
    %cst = arith.constant dense<0.000000e+00> : vector<128x32xf32>
    %2 = tpu.matmul %0, %1, %cst {dimension_numbers = #tpu.dot_dimension_numbers<[1], [0], [0], [1], [0, 0, 1, 1], [], []>} : vector<128x16xf32>, vector<16x32xf32>, vector<128x32xf32> -> vector<128x32xf32>
    %c0_3 = arith.constant 0 : index
    %c0_4 = arith.constant 0 : index
    %3 = vector.load %arg3[%c0_3, %c0_4] : memref<1x32xf32, #tpu.memory_space<vmem>>, vector<1x32xf32>
    %4 = vector.broadcast %3 : vector<1x32xf32> to vector<128x32xf32>
    %5 = arith.addf %2, %4 : vector<128x32xf32>
    %c0_5 = arith.constant 0 : index
    %c0_6 = arith.constant 0 : index
    %6 = vector.load %arg4[%c0_5, %c0_6] : memref<1x32xf32, #tpu.memory_space<vmem>>, vector<1x32xf32>
    %c0_7 = arith.constant 0 : index
    %c0_8 = arith.constant 0 : index
    %7 = vector.load %arg5[%c0_7, %c0_8] : memref<1x32xf32, #tpu.memory_space<vmem>>, vector<1x32xf32>
    %cst_9 = arith.constant dense<0.000000e+00> : vector<128xf32>
    %8 = vector.multi_reduction <add>, %5, %cst_9 [1] : vector<128x32xf32> to vector<128xf32>
    %9 = vector.shape_cast %8 : vector<128xf32> to vector<128x1xf32>
    %cst_10 = arith.constant 3.200000e+01 : f32
    %10 = vector.broadcast %cst_10 : f32 to vector<128x1xf32>
    %11 = arith.divf %9, %10 : vector<128x1xf32>
    %12 = vector.broadcast %11 : vector<128x1xf32> to vector<128x32xf32>
    %13 = arith.subf %5, %12 : vector<128x32xf32>
    %14 = arith.mulf %13, %13 : vector<128x32xf32>
    %cst_11 = arith.constant dense<0.000000e+00> : vector<128xf32>
    %15 = vector.multi_reduction <add>, %14, %cst_11 [1] : vector<128x32xf32> to vector<128xf32>
    %16 = vector.shape_cast %15 : vector<128xf32> to vector<128x1xf32>
    %cst_12 = arith.constant 3.200000e+01 : f32
    %17 = vector.broadcast %cst_12 : f32 to vector<128x1xf32>
    %18 = arith.divf %16, %17 : vector<128x1xf32>
    %19 = vector.broadcast %11 : vector<128x1xf32> to vector<128x32xf32>
    %20 = arith.subf %5, %19 : vector<128x32xf32>
    %cst_13 = arith.constant 9.99999974E-6 : f32
    %21 = vector.broadcast %cst_13 : f32 to vector<128x1xf32>
    %22 = arith.addf %18, %21 : vector<128x1xf32>
    %23 = math.rsqrt %22 : vector<128x1xf32>
    %24 = vector.broadcast %23 : vector<128x1xf32> to vector<128x32xf32>
    %25 = arith.mulf %20, %24 : vector<128x32xf32>
    %26 = vector.broadcast %6 : vector<1x32xf32> to vector<128x32xf32>
    %27 = arith.mulf %25, %26 : vector<128x32xf32>
    %28 = vector.broadcast %7 : vector<1x32xf32> to vector<128x32xf32>
    %29 = arith.addf %27, %28 : vector<128x32xf32>
    %cst_14 = arith.constant 0.000000e+00 : f32
    %30 = vector.broadcast %cst_14 : f32 to vector<128x32xf32>
    %31 = arith.maximumf %29, %30 : vector<128x32xf32>
    %c0_15 = arith.constant 0 : index
    %c0_16 = arith.constant 0 : index
    %32 = vector.load %arg6[%c0_15, %c0_16] : memref<32x32xf32, #tpu.memory_space<vmem>>, vector<32x32xf32>
    %cst_17 = arith.constant dense<0.000000e+00> : vector<128x32xf32>
    %33 = tpu.matmul %31, %32, %cst_17 {dimension_numbers = #tpu.dot_dimension_numbers<[1], [0], [0], [1], [0, 0, 1, 1], [], []>} : vector<128x32xf32>, vector<32x32xf32>, vector<128x32xf32> -> vector<128x32xf32>
    %c0_18 = arith.constant 0 : index
    %c0_19 = arith.constant 0 : index
    %34 = vector.load %arg7[%c0_18, %c0_19] : memref<1x32xf32, #tpu.memory_space<vmem>>, vector<1x32xf32>
    %35 = vector.broadcast %34 : vector<1x32xf32> to vector<128x32xf32>
    %36 = arith.addf %33, %35 : vector<128x32xf32>
    %c0_20 = arith.constant 0 : index
    %c0_21 = arith.constant 0 : index
    %37 = vector.load %arg8[%c0_20, %c0_21] : memref<1x32xf32, #tpu.memory_space<vmem>>, vector<1x32xf32>
    %c0_22 = arith.constant 0 : index
    %c0_23 = arith.constant 0 : index
    %38 = vector.load %arg9[%c0_22, %c0_23] : memref<1x32xf32, #tpu.memory_space<vmem>>, vector<1x32xf32>
    %cst_24 = arith.constant dense<0.000000e+00> : vector<128xf32>
    %39 = vector.multi_reduction <add>, %36, %cst_24 [1] : vector<128x32xf32> to vector<128xf32>
    %40 = vector.shape_cast %39 : vector<128xf32> to vector<128x1xf32>
    %cst_25 = arith.constant 3.200000e+01 : f32
    %41 = vector.broadcast %cst_25 : f32 to vector<128x1xf32>
    %42 = arith.divf %40, %41 : vector<128x1xf32>
    %43 = vector.broadcast %42 : vector<128x1xf32> to vector<128x32xf32>
    %44 = arith.subf %36, %43 : vector<128x32xf32>
    %45 = arith.mulf %44, %44 : vector<128x32xf32>
    %cst_26 = arith.constant dense<0.000000e+00> : vector<128xf32>
    %46 = vector.multi_reduction <add>, %45, %cst_26 [1] : vector<128x32xf32> to vector<128xf32>
    %47 = vector.shape_cast %46 : vector<128xf32> to vector<128x1xf32>
    %cst_27 = arith.constant 3.200000e+01 : f32
    %48 = vector.broadcast %cst_27 : f32 to vector<128x1xf32>
    %49 = arith.divf %47, %48 : vector<128x1xf32>
    %50 = vector.broadcast %42 : vector<128x1xf32> to vector<128x32xf32>
    %51 = arith.subf %36, %50 : vector<128x32xf32>
    %cst_28 = arith.constant 9.99999974E-6 : f32
    %52 = vector.broadcast %cst_28 : f32 to vector<128x1xf32>
    %53 = arith.addf %49, %52 : vector<128x1xf32>
    %54 = math.rsqrt %53 : vector<128x1xf32>
    %55 = vector.broadcast %54 : vector<128x1xf32> to vector<128x32xf32>
    %56 = arith.mulf %51, %55 : vector<128x32xf32>
    %57 = vector.broadcast %37 : vector<1x32xf32> to vector<128x32xf32>
    %58 = arith.mulf %56, %57 : vector<128x32xf32>
    %59 = vector.broadcast %38 : vector<1x32xf32> to vector<128x32xf32>
    %60 = arith.addf %58, %59 : vector<128x32xf32>
    %cst_29 = arith.constant 0.000000e+00 : f32
    %61 = vector.broadcast %cst_29 : f32 to vector<128x32xf32>
    %62 = arith.maximumf %60, %61 : vector<128x32xf32>
    %c0_30 = arith.constant 0 : index
    %c0_31 = arith.constant 0 : index
    %63 = vector.load %arg12[%c0_30, %c0_31] : memref<128x32xf32, #tpu.memory_space<vmem>>, vector<128x32xf32>
    tpu.vector_store %arg12[%c0_30, %c0_31], %62 {strides = array<i32>} : memref<128x32xf32, #tpu.memory_space<vmem>>, vector<128x32xf32>,
    %c0_32 = arith.constant 0 : index
    %c0_33 = arith.constant 0 : index
    %64 = vector.load %arg10[%c0_32, %c0_33] : memref<32x64xf32, #tpu.memory_space<vmem>>, vector<32x64xf32>
    %cst_34 = arith.constant dense<0.000000e+00> : vector<128x64xf32>
    %65 = tpu.matmul %62, %64, %cst_34 {dimension_numbers = #tpu.dot_dimension_numbers<[1], [0], [0], [1], [0, 0, 1, 1], [], []>} : vector<128x32xf32>, vector<32x64xf32>, vector<128x64xf32> -> vector<128x64xf32>
    %c0_35 = arith.constant 0 : index
    %c0_36 = arith.constant 0 : index
    %66 = vector.load %arg11[%c0_35, %c0_36] : memref<1x64xf32, #tpu.memory_space<vmem>>, vector<1x64xf32>
    %67 = vector.broadcast %66 : vector<1x64xf32> to vector<128x64xf32>
    %68 = arith.addf %65, %67 : vector<128x64xf32>
    %c0_37 = arith.constant 0 : index
    %c0_38 = arith.constant 0 : index
    %69 = vector.load %arg13[%c0_37, %c0_38] : memref<128x64xf32, #tpu.memory_space<vmem>>, vector<128x64xf32>
    tpu.vector_store %arg13[%c0_37, %c0_38], %68 {strides = array<i32>} : memref<128x64xf32, #tpu.memory_space<vmem>>, vector<128x64xf32>,
    return
  }
  func.func @transform_0(%arg0: i32) -> (i32, i32) {
    %c0_i32 = arith.constant 0 : i32
    %c0_i32_0 = arith.constant 0 : i32
    return %arg0, %c0_i32 : i32, i32
  }
  func.func @transform_1(%arg0: i32) -> (i32, i32) {
    %c0_i32 = arith.constant 0 : i32
    %c0_i32_0 = arith.constant 0 : i32
    %c0_i32_1 = arith.constant 0 : i32
    return %c0_i32, %c0_i32_0 : i32, i32
  }
  func.func @transform_2(%arg0: i32) -> (i32, i32) {
    %c0_i32 = arith.constant 0 : i32
    %c0_i32_0 = arith.constant 0 : i32
    %c0_i32_1 = arith.constant 0 : i32
    return %c0_i32, %c0_i32_0 : i32, i32
  }
  func.func @transform_3(%arg0: i32) -> (i32, i32) {
    %c0_i32 = arith.constant 0 : i32
    %c0_i32_0 = arith.constant 0 : i32
    %c0_i32_1 = arith.constant 0 : i32
    return %c0_i32, %c0_i32_0 : i32, i32
  }
  func.func @transform_4(%arg0: i32) -> (i32, i32) {
    %c0_i32 = arith.constant 0 : i32
    %c0_i32_0 = arith.constant 0 : i32
    %c0_i32_1 = arith.constant 0 : i32
    return %c0_i32, %c0_i32_0 : i32, i32
  }
  func.func @transform_5(%arg0: i32) -> (i32, i32) {
    %c0_i32 = arith.constant 0 : i32
    %c0_i32_0 = arith.constant 0 : i32
    %c0_i32_1 = arith.constant 0 : i32
    return %c0_i32, %c0_i32_0 : i32, i32
  }
  func.func @transform_6(%arg0: i32) -> (i32, i32) {
    %c0_i32 = arith.constant 0 : i32
    %c0_i32_0 = arith.constant 0 : i32
    %c0_i32_1 = arith.constant 0 : i32
    return %c0_i32, %c0_i32_0 : i32, i32
  }
  func.func @transform_7(%arg0: i32) -> (i32, i32) {
    %c0_i32 = arith.constant 0 : i32
    %c0_i32_0 = arith.constant 0 : i32
    %c0_i32_1 = arith.constant 0 : i32
    return %c0_i32, %c0_i32_0 : i32, i32
  }
  func.func @transform_8(%arg0: i32) -> (i32, i32) {
    %c0_i32 = arith.constant 0 : i32
    %c0_i32_0 = arith.constant 0 : i32
    %c0_i32_1 = arith.constant 0 : i32
    return %c0_i32, %c0_i32_0 : i32, i32
  }
  func.func @transform_9(%arg0: i32) -> (i32, i32) {
    %c0_i32 = arith.constant 0 : i32
    %c0_i32_0 = arith.constant 0 : i32
    %c0_i32_1 = arith.constant 0 : i32
    return %c0_i32, %c0_i32_0 : i32, i32
  }
  func.func @transform_10(%arg0: i32) -> (i32, i32) {
    %c0_i32 = arith.constant 0 : i32
    %c0_i32_0 = arith.constant 0 : i32
    %c0_i32_1 = arith.constant 0 : i32
    return %c0_i32, %c0_i32_0 : i32, i32
  }
  func.func @transform_11(%arg0: i32) -> (i32, i32) {
    %c0_i32 = arith.constant 0 : i32
    %c0_i32_0 = arith.constant 0 : i32
    return %arg0, %c0_i32 : i32, i32
  }
  func.func @transform_12(%arg0: i32) -> (i32, i32) {
    %c0_i32 = arith.constant 0 : i32
    %c0_i32_0 = arith.constant 0 : i32
    return %arg0, %c0_i32 : i32, i32
  }
}

</mosaic_0001>

<bundles_post_ra>
// kernel: tpu_custom_call.1
= control target key start
LH: loop header
LB: loop body
LE: loop exit
PB: predicated region body
PF: predicated region fallthrough
CT: control target
= control target key end

     0   :  { %vm65_vm0 = vcmask 130048   ;;  %vm261_vm1 = vcmask 261120   ;;  %vm1225_vm2 = vcmask 523264   ;;  %s2293_s1 = inlined_call_operand.vmem [shape: f32[16,32], index: 1, kind: input, shape index: {}]   ;;  %s2294_s0 = inlined_call_operand.vmem [shape: f32[128,16], index: 0, kind: input, shape index: {}]   ;;  %s2295_s2 = inlined_call_operand.vmem [shape: f32[1,32], index: 2, kind: input, shape index: {}]   ;;  %s2296_s5 = inlined_call_operand.vmem [shape: f32[32,32], index: 5, kind: input, shape index: {}]   ;;  %s2297_s3 = inlined_call_operand.vmem [shape: f32[1,32], index: 3, kind: input, shape index: {}]   ;;  %s2298_s4 = inlined_call_operand.vmem [shape: f32[1,32], index: 4, kind: input, shape index: {}]   ;;  %s2299_s6 = inlined_call_operand.vmem [shape: f32[1,32], index: 6, kind: input, shape index: {}]   ;;  %s2300_s9 = inlined_call_operand.vmem [shape: f32[32,64], index: 9, kind: input, shape index: {}]   ;;  %s2301_s7 = inlined_call_operand.vmem [shape: f32[1,32], index: 7, kind: input, shape index: {}]   ;;  %s2302_s8 = inlined_call_operand.vmem [shape: f32[1,32], index: 8, kind: input, shape index: {}]   ;;  %s2303_s11 = inlined_call_operand.vmem [shape: f32[128,32], index: 11, kind: output, shape index: {0}]   ;;  %s2304_s10 = inlined_call_operand.vmem [shape: f32[1,64], index: 10, kind: input, shape index: {}]   ;;  %s2305_s12 = inlined_call_operand.vmem [shape: f32[128,64], index: 12, kind: output, shape index: {1}]  }
   0x1   :  { %v56_v0 = vld [vmem:[%s2293_s1] sm:$0xff]  ;;  %v57_v1 = vld [vmem:[%s2293_s1 + $0x8] sm:$0xff]  ;;  %v42_v7 = vld [vmem:[%s2294_s0 + $0x10] sm:$0xff] }
   0x2   :  { %v40_v2 = vld [vmem:[%s2294_s0] sm:$0xff]  ;;  %v1455_v3 = vpack.c.bf16 %v57_v1, %v56_v0  ;;  %v41_v5 = vld [vmem:[%s2294_s0 + $0x8] sm:$0xff]  ;;  %v50_v8 = vld [vmem:[%s2294_s0 + $0x50] sm:$0xff] }
   0x3   :  { %1367 = vmatprep.mubr.msk.f32.mxu0 %vm65_vm0, %v40_v2  ;;  %v48_v4 = vld [vmem:[%s2294_s0 + $0x40] sm:$0xff]  ;;  %v49_v6 = vld [vmem:[%s2294_s0 + $0x48] sm:$0xff]  ;;  %v43_v9 = vld [vmem:[%s2294_s0 + $0x18] sm:$0xff] }
   0x4   :  { %1456 = vmatprep.subr.bf16.mxu0 %v1455_v3  ;;  %1475 = vmatprep.subr.bf16.mxu1 %v1455_v3  ;;  %v51_v10 = vld [vmem:[%s2294_s0 + $0x58] sm:$0xff]  ;;  %v44_v11 = vld [vmem:[%s2294_s0 + $0x20] sm:$0xff]  ;;  %v45_v13 = vld [vmem:[%s2294_s0 + $0x28] sm:$0xff] }
   0x5   :  { %1458 = vmatpush3.bf16.msra.mxu0 %v1455_v3  ;;  %1476 = vmatpush3.bf16.msra.mxu1 %v1455_v3  ;;  %v52_v12 = vld [vmem:[%s2294_s0 + $0x60] sm:$0xff]  ;;  %v53_v14 = vld [vmem:[%s2294_s0 + $0x68] sm:$0xff]  ;;  %v46_v15 = vld [vmem:[%s2294_s0 + $0x30] sm:$0xff] }
   0x6   :  { %1379 = vmatprep.mubr.msk.f32.mxu1 %vm65_vm0, %v48_v4  ;;  %v54_v16 = vld [vmem:[%s2294_s0 + $0x70] sm:$0xff]  ;;  %v47_v17 = vld [vmem:[%s2294_s0 + $0x38] sm:$0xff]  ;;  %v1250_v19 = vld [vmem:[%s2295_s2] ss:$0 sm:$0xff] }
   0x7   :  { %v55_v18 = vld [vmem:[%s2294_s0 + $0x78] sm:$0xff] }
   0x8   :  { %1368 = vmatmul.mubr.msk.f32.vlgmr.msra.gmra.mrb[0].mxu0 %vm65_vm0, %v41_v5  ;;  %1380 = vmatmul.mubr.msk.f32.vlgmr.msra.gmra.mrb[0].mxu1 %vm65_vm0, %v49_v6 }
   0x9   :  { %1370 = vmatprep.mubr.msk.f32.mxu0 %vm65_vm0, %v42_v7  ;;  %1382 = vmatprep.mubr.msk.f32.mxu1 %vm65_vm0, %v50_v8 }
   0xc   :  { %1371 = vmatmul.mubr.msk.f32.gmra.mrb[2].mxu0 %vm65_vm0, %v43_v9  ;;  %1383 = vmatmul.mubr.msk.f32.gmra.mrb[2].mxu1 %vm65_vm0, %v51_v10 }
   0xd   :  { %1373 = vmatprep.mubr.msk.f32.mxu0 %vm65_vm0, %v44_v11  ;;  %1385 = vmatprep.mubr.msk.f32.mxu1 %vm65_vm0, %v52_v12 }
  0x10   :  { %1374 = vmatmul.mubr.msk.f32.gmra.mrb[4].mxu0 %vm65_vm0, %v45_v13  ;;  %1386 = vmatmul.mubr.msk.f32.gmra.mrb[4].mxu1 %vm65_vm0, %v53_v14 }
  0x11   :  { %1376 = vmatprep.mubr.msk.f32.mxu0 %vm65_vm0, %v46_v15  ;;  %1388 = vmatprep.mubr.msk.f32.mxu1 %vm65_vm0, %v54_v16 }
  0x14   :  { %1377 = vmatmul.mubr.msk.f32.gmra.mrb[6].mxu0 %vm65_vm0, %v47_v17  ;;  %1389 = vmatmul.mubr.msk.f32.gmra.mrb[6].mxu1 %vm65_vm0, %v55_v18 }
  0xdb   :  { %v1369_v20 = vpop.f32.mrb[0].mxu0  ;;  %v1381_v21 = vpop.f32.mrb[0].mxu1 }
  0xdc   :  { %v180_v22 = vpop.f32.mrb[1].mxu0  ;;  %v220_v23 = vpop.f32.mrb[1].mxu1  ;;  %v1679_v25 = vadd.f32 %v1369_v20, %v1250_v19  ;;  %v1706_v54 = vadd.f32 %v1381_v21, %v1250_v19 }
  0xdd   :  { %v181_v24 = vadd.f32 %v1250_v19, %v180_v22  ;;  %v1694_v48 = vadd.f32 %v1250_v19, %v220_v23 }
  0xde   :  { %v265_v35 = vsel %vm261_vm1, %v1679_v25, 0.0  ;;  %v289_v59 = vsel %vm261_vm1, %v1706_v54, 0.0 }
  0xdf   :  { %v1372_v26 = vpop.f32.mrb[2].mxu0  ;;  %v262_v27 = vsel %vm261_vm1, %v181_v24, 0.0  ;;  %v1384_v28 = vpop.f32.mrb[2].mxu1  ;;  %v286_v53 = vsel %vm261_vm1, %v1694_v48, 0.0 }
  0xe0   :  { %v190_v29 = vpop.f32.mrb[3].mxu0  ;;  %263 = vadd.xlane.f32.xlu0 %v262_v27  ;;  %v230_v30 = vpop.f32.mrb[3].mxu1  ;;  %v1682_v32 = vadd.f32 %v1372_v26, %v1250_v19  ;;  %v1714_v58 = vadd.f32 %v1384_v28, %v1250_v19 }
  0xe1   :  { %v191_v31 = vadd.f32 %v1250_v19, %v190_v29  ;;  %v1702_v52 = vadd.f32 %v1250_v19, %v230_v30 }
  0xe2   :  { %v271_v42 = vsel %vm261_vm1, %v1682_v32, 0.0  ;;  %v295_v63 = vsel %vm261_vm1, %v1714_v58, 0.0 }
  0xe3   :  { %v1375_v33 = vpop.f32.mrb[4].mxu0  ;;  %v268_v34 = vsel %vm261_vm1, %v191_v31, 0.0  ;;  %v1387_v36 = vpop.f32.mrb[4].mxu1  ;;  %v292_v57 = vsel %vm261_vm1, %v1702_v52, 0.0 }
  0xe4   :  { %v200_v37 = vpop.f32.mrb[5].mxu0  ;;  %269 = vadd.xlane.f32.xlu1 %v268_v34  ;;  %266 = vadd.xlane.f32.xlu0 %v265_v35  ;;  %v240_v38 = vpop.f32.mrb[5].mxu1  ;;  %v1687_v40 = vadd.f32 %v1375_v33, %v1250_v19  ;;  %v1722_v62 = vadd.f32 %v1387_v36, %v1250_v19 }
  0xe5   :  { %v201_v39 = vadd.f32 %v1250_v19, %v200_v37  ;;  %v1710_v56 = vadd.f32 %v1250_v19, %v240_v38 }
  0xe6   :  { %v277_v50 = vsel %vm261_vm1, %v1687_v40, 0.0  ;;  %v301_v2 = vsel %vm261_vm1, %v1722_v62, 0.0 }
  0xe7   :  { %v1378_v41 = vpop.f32.mrb[6].mxu0  ;;  %v274_v43 = vsel %vm261_vm1, %v201_v39, 0.0  ;;  %v1390_v44 = vpop.f32.mrb[6].mxu1  ;;  %v298_v61 = vsel %vm261_vm1, %v1710_v56, 0.0 }
  0xe8   :  { %v210_v45 = vpop.f32.mrb[7].mxu0  ;;  %272 = vadd.xlane.f32.xlu1 %v271_v42  ;;  %275 = vadd.xlane.f32.xlu0 %v274_v43  ;;  %v250_v46 = vpop.f32.mrb[7].mxu1  ;;  %v1696_v49 = vadd.f32 %v1378_v41, %v1250_v19  ;;  %v1728_v1 = vadd.f32 %v1390_v44, %v1250_v19 }
  0xe9   :  { %v1692_v47 = vadd.f32 %v1250_v19, %v210_v45  ;;  %v1718_v60 = vadd.f32 %v1250_v19, %v250_v46 }
  0xea   :  { %v283_v55 = vsel %vm261_vm1, %v1696_v49, 0.0  ;;  %v307_v3 = vsel %vm261_vm1, %v1728_v1, 0.0 }
  0xeb   :  { %v280_v51 = vsel %vm261_vm1, %v1692_v47, 0.0  ;;  %v304_v0 = vsel %vm261_vm1, %v1718_v60, 0.0 }
  0xec   :  { %278 = vadd.xlane.f32.xlu1 %v277_v50  ;;  %281 = vadd.xlane.f32.xlu0 %v280_v51 }
  0xf0   :  { %284 = vadd.xlane.f32.xlu1 %v283_v55  ;;  %287 = vadd.xlane.f32.xlu0 %v286_v53 }
  0xf4   :  { %290 = vadd.xlane.f32.xlu1 %v289_v59  ;;  %293 = vadd.xlane.f32.xlu0 %v292_v57 }
  0xf8   :  { %296 = vadd.xlane.f32.xlu1 %v295_v63  ;;  %299 = vadd.xlane.f32.xlu0 %v298_v61 }
  0xfc   :  { %302 = vadd.xlane.f32.xlu1 %v301_v2  ;;  %305 = vadd.xlane.f32.xlu0 %v304_v0 }
 0x100   :  { %308 = vadd.xlane.f32.xlu1 %v307_v3 }
 0x16d   :  { %v264_v4 = vpop.xlane.xlu0 %263 }
 0x16e   :  { %v311_v5 = vmul.f32 0.03125, %v264_v4 }
 0x170   :  { %v1734_v6 = vsub.f32 %v181_v24, %v311_v5 }
 0x171   :  { %v270_v7 = vpop.xlane.xlu1 %269  ;;  %v267_v8 = vpop.xlane.xlu0 %266 }
 0x172   :  { %v313_v9 = vmul.f32 0.03125, %v270_v7  ;;  %v312_v10 = vmul.f32 0.03125, %v267_v8  ;;  %v343_v11 = vmul.f32 %v1734_v6, %v1734_v6 }
 0x174   :  { %v1738_v12 = vsub.f32 %v191_v31, %v313_v9  ;;  %v1741_v13 = vsub.f32 %v1679_v25, %v312_v10  ;;  %v359_v14 = vsel %vm261_vm1, %v343_v11, 0.0 }
 0x175   :  { %v273_v15 = vpop.xlane.xlu1 %272  ;;  %360 = vadd.xlane.f32.xlu0 %v359_v14  ;;  %v276_v16 = vpop.xlane.xlu0 %275 }
 0x176   :  { %v314_v17 = vmul.f32 0.03125, %v273_v15  ;;  %v315_v18 = vmul.f32 0.03125, %v276_v16  ;;  %v345_v19 = vmul.f32 %v1738_v12, %v1738_v12  ;;  %v344_v20 = vmul.f32 %v1741_v13, %v1741_v13 }
 0x178   :  { %v1749_v21 = vsub.f32 %v1682_v32, %v314_v17  ;;  %v1751_v22 = vsub.f32 %v201_v39, %v315_v18  ;;  %v365_v23 = vsel %vm261_vm1, %v345_v19, 0.0  ;;  %v362_v24 = vsel %vm261_vm1, %v344_v20, 0.0 }
 0x179   :  { %v279_v25 = vpop.xlane.xlu1 %278  ;;  %366 = vadd.xlane.f32.xlu0 %v365_v23  ;;  %363 = vadd.xlane.f32.xlu1 %v362_v24  ;;  %v282_v26 = vpop.xlane.xlu0 %281 }
 0x17a   :  { %v316_v27 = vmul.f32 0.03125, %v279_v25  ;;  %v317_v28 = vmul.f32 0.03125, %v282_v26  ;;  %v346_v29 = vmul.f32 %v1749_v21, %v1749_v21  ;;  %v347_v30 = vmul.f32 %v1751_v22, %v1751_v22  ;;  %v531_v26 = vld [vmem:[%s2296_s5] sm:$0xff] }
 0x17c   :  { %v1760_v31 = vsub.f32 %v1687_v40, %v316_v27  ;;  %v1763_v32 = vsub.f32 %v1692_v47, %v317_v28  ;;  %v368_v33 = vsel %vm261_vm1, %v346_v29, 0.0  ;;  %v371_v34 = vsel %vm261_vm1, %v347_v30, 0.0  ;;  %v533_v28 = vld [vmem:[%s2296_s5 + $0x10] sm:$0xff]  ;;  %v534_v29 = vld [vmem:[%s2296_s5 + $0x18] sm:$0xff] }
 0x17d   :  { %v285_v35 = vpop.xlane.xlu1 %284  ;;  %369 = vadd.xlane.f32.xlu1 %v368_v33  ;;  %372 = vadd.xlane.f32.xlu0 %v371_v34  ;;  %v288_v36 = vpop.xlane.xlu0 %287  ;;  %v1463_v30 = vpack.c.bf16 %v534_v29, %v533_v28 }
 0x17e   :  { %v318_v37 = vmul.f32 0.03125, %v285_v35  ;;  %v319_v38 = vmul.f32 0.03125, %v288_v36  ;;  %v348_v39 = vmul.f32 %v1760_v31, %v1760_v31  ;;  %v349_v40 = vmul.f32 %v1763_v32, %v1763_v32 }
 0x180   :  { %v1772_v41 = vsub.f32 %v1696_v49, %v318_v37  ;;  %v1775_v42 = vsub.f32 %v1694_v48, %v319_v38  ;;  %v374_v43 = vsel %vm261_vm1, %v348_v39, 0.0  ;;  %v377_v44 = vsel %vm261_vm1, %v349_v40, 0.0 }
 0x181   :  { %v291_v45 = vpop.xlane.xlu1 %290  ;;  %375 = vadd.xlane.f32.xlu1 %v374_v43  ;;  %378 = vadd.xlane.f32.xlu0 %v377_v44  ;;  %v294_v46 = vpop.xlane.xlu0 %293 }
 0x182   :  { %v320_v47 = vmul.f32 0.03125, %v291_v45  ;;  %v321_v50 = vmul.f32 0.03125, %v294_v46  ;;  %v350_v51 = vmul.f32 %v1772_v41, %v1772_v41  ;;  %v351_v49 = vmul.f32 %v1775_v42, %v1775_v42 }
 0x184   :  { %v1784_v53 = vsub.f32 %v1706_v54, %v320_v47  ;;  %v1787_v48 = vsub.f32 %v1702_v52, %v321_v50  ;;  %v380_v55 = vsel %vm261_vm1, %v350_v51, 0.0  ;;  %v383_v57 = vsel %vm261_vm1, %v351_v49, 0.0 }
 0x185   :  { %v297_v59 = vpop.xlane.xlu1 %296  ;;  %381 = vadd.xlane.f32.xlu1 %v380_v55  ;;  %384 = vadd.xlane.f32.xlu0 %v383_v57  ;;  %v300_v61 = vpop.xlane.xlu0 %299 }
 0x186   :  { %v322_v63 = vmul.f32 0.03125, %v297_v59  ;;  %v323_v0 = vmul.f32 0.03125, %v300_v61  ;;  %v352_v2 = vmul.f32 %v1784_v53, %v1784_v53  ;;  %v353_v54 = vmul.f32 %v1787_v48, %v1787_v48 }
 0x188   :  { %v1796_v3 = vsub.f32 %v1714_v58, %v322_v63  ;;  %v1799_v52 = vsub.f32 %v1710_v56, %v323_v0  ;;  %v386_v4 = vsel %vm261_vm1, %v352_v2, 0.0  ;;  %v389_v5 = vsel %vm261_vm1, %v353_v54, 0.0  ;;  %v1842_v63 = vld [vmem:[%s2297_s3] ss:$0 sm:$0xff] }
 0x189   :  { %v303_v7 = vpop.xlane.xlu1 %302  ;;  %387 = vadd.xlane.f32.xlu1 %v386_v4  ;;  %390 = vadd.xlane.f32.xlu0 %v389_v5  ;;  %v306_v8 = vpop.xlane.xlu0 %305 }
 0x18a   :  { %v324_v9 = vmul.f32 0.03125, %v303_v7  ;;  %v325_v10 = vmul.f32 0.03125, %v306_v8  ;;  %v354_v11 = vmul.f32 %v1796_v3, %v1796_v3  ;;  %v355_v58 = vmul.f32 %v1799_v52, %v1799_v52  ;;  %v1848_v7 = vld [vmem:[%s2298_s4] ss:$0 sm:$0xff] }
 0x18c   :  { %v1808_v14 = vsub.f32 %v1722_v62, %v324_v9  ;;  %v1811_v56 = vsub.f32 %v1718_v60, %v325_v10  ;;  %v392_v15 = vsel %vm261_vm1, %v354_v11, 0.0  ;;  %v395_v16 = vsel %vm261_vm1, %v355_v58, 0.0 }
 0x18d   :  { %v309_v17 = vpop.xlane.xlu1 %308  ;;  %393 = vadd.xlane.f32.xlu1 %v392_v15  ;;  %396 = vadd.xlane.f32.xlu0 %v395_v16 }
 0x18e   :  { %v326_v18 = vmul.f32 0.03125, %v309_v17  ;;  %v356_v19 = vmul.f32 %v1808_v14, %v1808_v14  ;;  %v357_v20 = vmul.f32 %v1811_v56, %v1811_v56 }
 0x190   :  { %v1820_v62 = vsub.f32 %v1728_v1, %v326_v18  ;;  %v398_v60 = vsel %vm261_vm1, %v356_v19, 0.0  ;;  %v401_v23 = vsel %vm261_vm1, %v357_v20, 0.0  ;;  %v532_v1 = vld [vmem:[%s2296_s5 + $0x8] sm:$0xff] }
 0x191   :  { %399 = vadd.xlane.f32.xlu1 %v398_v60  ;;  %402 = vadd.xlane.f32.xlu0 %v401_v23  ;;  %v1459_v27 = vpack.c.bf16 %v532_v1, %v531_v26 }
 0x192   :  { %v358_v24 = vmul.f32 %v1820_v62, %v1820_v62 }
 0x193   :  { %1460 = vmatprep.subr.bf16.mxu1 %v1459_v27 }
 0x194   :  { %v404_v25 = vsel %vm261_vm1, %v358_v24, 0.0  ;;  %1462 = vmatpush3.bf16.msra.mxu1 %v1459_v27 }
 0x195   :  { %405 = vadd.xlane.f32.xlu1 %v404_v25  ;;  %1464 = vmatprep.subr.bf16.mxu1 %v1463_v30 }
 0x198   :  { %1466 = vmatpush3.bf16.msra.mxu1 %v1463_v30 }
 0x202   :  { %v361_v33 = vpop.xlane.xlu0 %360 }
 0x203   :  { %v407_v34 = vmul.f32 0.03125, %v361_v33 }
 0x205   :  { %v423_v35 = vadd.f32 1e-05, %v407_v34 }
 0x206   :  { %v364_v36 = vpop.xlane.xlu1 %363  ;;  %v367_v37 = vpop.xlane.xlu0 %366 }
 0x207   :  { %1477 = vrsqrt.f32 %v423_v35  ;;  %v408_v38 = vmul.f32 0.03125, %v364_v36  ;;  %v409_v39 = vmul.f32 0.03125, %v367_v37 }
 0x209   :  { %v424_v40 = vadd.f32 1e-05, %v408_v38  ;;  %v425_v43 = vadd.f32 1e-05, %v409_v39 }
 0x20a   :  { %v370_v44 = vpop.xlane.xlu1 %369  ;;  %v373_v45 = vpop.xlane.xlu0 %372 }
 0x20b   :  { %1479 = vrsqrt.f32 %v424_v40  ;;  %v410_v46 = vmul.f32 0.03125, %v370_v44  ;;  %v411_v47 = vmul.f32 0.03125, %v373_v45 }
 0x20c   :  { %1481 = vrsqrt.f32 %v425_v43 }
 0x20d   :  { %v426_v50 = vadd.f32 1e-05, %v410_v46  ;;  %v427_v51 = vadd.f32 1e-05, %v411_v47 }
 0x20e   :  { %v376_v49 = vpop.xlane.xlu1 %375  ;;  %v379_v55 = vpop.xlane.xlu0 %378 }
 0x20f   :  { %1483 = vrsqrt.f32 %v426_v50  ;;  %v412_v57 = vmul.f32 0.03125, %v376_v49  ;;  %v413_v59 = vmul.f32 0.03125, %v379_v55 }
 0x210   :  { %1485 = vrsqrt.f32 %v427_v51 }
 0x211   :  { %v1478_v61 = vpop.eup %1477  ;;  %v428_v0 = vadd.f32 1e-05, %v412_v57  ;;  %v429_v2 = vadd.f32 1e-05, %v413_v59 }
 0x212   :  { %v382_v54 = vpop.xlane.xlu1 %381  ;;  %v385_v4 = vpop.xlane.xlu0 %384  ;;  %v455_v5 = vmul.f32 %v1478_v61, %v1734_v6 }
 0x213   :  { %1487 = vrsqrt.f32 %v428_v0  ;;  %v414_v8 = vmul.f32 0.03125, %v382_v54  ;;  %v415_v9 = vmul.f32 0.03125, %v385_v4 }
 0x214   :  { %1489 = vrsqrt.f32 %v429_v2  ;;  %v477_v10 = vmul.f32 %v1842_v63, %v455_v5 }
 0x215   :  { %v1480_v11 = vpop.eup %1479  ;;  %v430_v58 = vadd.f32 1e-05, %v414_v8  ;;  %v431_v15 = vadd.f32 1e-05, %v415_v9 }
 0x216   :  { %v1482_v16 = vpop.eup %1481  ;;  %v456_v17 = vmul.f32 %v1480_v11, %v1741_v13  ;;  %v388_v18 = vpop.xlane.xlu1 %387  ;;  %v499_v6 = vadd.f32 %v1848_v7, %v477_v10 }
 0x217   :  { %v391_v19 = vpop.xlane.xlu0 %390  ;;  %1491 = vrsqrt.f32 %v430_v58  ;;  %v416_v20 = vmul.f32 0.03125, %v388_v18  ;;  %v457_v23 = vmul.f32 %v1482_v16, %v1738_v12 }
 0x218   :  { %v417_v60 = vmul.f32 0.03125, %v391_v19  ;;  %v478_v24 = vmul.f32 %v1842_v63, %v456_v17  ;;  %1493 = vrsqrt.f32 %v431_v15  ;;  %v515_v25 = vmax.f32 %v499_v6, 0.0 }
 0x219   :  { %v1484_v26 = vpop.eup %1483  ;;  %v432_v1 = vadd.f32 1e-05, %v416_v20  ;;  %v479_v28 = vmul.f32 %v1842_v63, %v457_v23 }
 0x21a   :  { %v433_v27 = vadd.f32 1e-05, %v417_v60  ;;  %v1486_v29 = vpop.eup %1485  ;;  %v500_v13 = vadd.f32 %v1848_v7, %v478_v24  ;;  %v394_v30 = vpop.xlane.xlu1 %393  ;;  %1399 = vmatprep.mubr.msk.f32.mxu1 %vm261_vm1, %v515_v25  ;;  %v458_v34 = vmul.f32 %v1484_v26, %v1749_v21 }
 0x21b   :  { %v397_v33 = vpop.xlane.xlu0 %396  ;;  %1495 = vrsqrt.f32 %v432_v1  ;;  %v418_v12 = vmul.f32 0.03125, %v394_v30  ;;  %v501_v36 = vadd.f32 %v1848_v7, %v479_v28  ;;  %v459_v39 = vmul.f32 %v1486_v29, %v1751_v22 }
 0x21c   :  { %v419_v35 = vmul.f32 0.03125, %v397_v33  ;;  %v516_v37 = vmax.f32 %v500_v13, 0.0  ;;  %1497 = vrsqrt.f32 %v433_v27  ;;  %v480_v38 = vmul.f32 %v1842_v63, %v458_v34 }
 0x21d   :  { %v1488_v40 = vpop.eup %1487  ;;  %v434_v43 = vadd.f32 1e-05, %v418_v12  ;;  %v517_v45 = vmax.f32 %v501_v36, 0.0  ;;  %v481_v51 = vmul.f32 %v1842_v63, %v459_v39 }
 0x21e   :  { %v435_v44 = vadd.f32 1e-05, %v419_v35  ;;  %v1490_v46 = vpop.eup %1489  ;;  %v400_v47 = vpop.xlane.xlu1 %399  ;;  %1400 = vmatmul.mubr.msk.f32.vlgmr.msra.gmra.mrb[8].mxu1 %vm261_vm1, %v516_v37  ;;  %v502_v50 = vadd.f32 %v1848_v7, %v480_v38  ;;  %v460_v49 = vmul.f32 %v1488_v40, %v1760_v31 }
 0x21f   :  { %v403_v21 = vpop.xlane.xlu0 %402  ;;  %1499 = vrsqrt.f32 %v434_v43  ;;  %v420_v55 = vmul.f32 0.03125, %v400_v47  ;;  %1402 = vmatprep.mubr.msk.f32.mxu1 %vm261_vm1, %v517_v45  ;;  %v461_v22 = vmul.f32 %v1490_v46, %v1763_v32  ;;  %v503_v61 = vadd.f32 %v1848_v7, %v481_v51 }
 0x220   :  { %v421_v57 = vmul.f32 0.03125, %v403_v21  ;;  %1501 = vrsqrt.f32 %v435_v44  ;;  %v518_v59 = vmax.f32 %v502_v50, 0.0  ;;  %v482_v0 = vmul.f32 %v1842_v63, %v460_v49 }
 0x221   :  { %v1492_v2 = vpop.eup %1491  ;;  %v436_v54 = vadd.f32 1e-05, %v420_v55  ;;  %v483_v5 = vmul.f32 %v1842_v63, %v461_v22  ;;  %v519_v9 = vmax.f32 %v503_v61, 0.0 }
 0x222   :  { %v437_v4 = vadd.f32 1e-05, %v421_v57  ;;  %v1494_v8 = vpop.eup %1493  ;;  %v406_v31 = vpop.xlane.xlu1 %405  ;;  %1403 = vmatmul.mubr.msk.f32.gmra.mrb[10].mxu1 %vm261_vm1, %v518_v59  ;;  %v504_v10 = vadd.f32 %v1848_v7, %v482_v0  ;;  %v462_v32 = vmul.f32 %v1492_v2, %v1772_v41 }
 0x223   :  { %1503 = vrsqrt.f32 %v436_v54  ;;  %v422_v11 = vmul.f32 0.03125, %v406_v31  ;;  %v505_v58 = vadd.f32 %v1848_v7, %v483_v5  ;;  %v463_v15 = vmul.f32 %v1494_v8, %v1775_v42  ;;  %1405 = vmatprep.mubr.msk.f32.mxu1 %vm261_vm1, %v519_v9 }
 0x224   :  { %1505 = vrsqrt.f32 %v437_v4  ;;  %v520_v16 = vmax.f32 %v504_v10, 0.0  ;;  %v484_v17 = vmul.f32 %v1842_v63, %v462_v32 }
 0x225   :  { %v1496_v18 = vpop.eup %1495  ;;  %v438_v19 = vadd.f32 1e-05, %v422_v11  ;;  %v521_v6 = vmax.f32 %v505_v58, 0.0  ;;  %v485_v20 = vmul.f32 %v1842_v63, %v463_v15 }
 0x226   :  { %v1498_v60 = vpop.eup %1497  ;;  %1406 = vmatmul.mubr.msk.f32.gmra.mrb[12].mxu1 %vm261_vm1, %v520_v16  ;;  %v506_v41 = vadd.f32 %v1848_v7, %v484_v17  ;;  %v464_v23 = vmul.f32 %v1496_v18, %v1784_v53 }
 0x227   :  { %1507 = vrsqrt.f32 %v438_v19  ;;  %1408 = vmatprep.mubr.msk.f32.mxu1 %vm261_vm1, %v521_v6  ;;  %v507_v42 = vadd.f32 %v1848_v7, %v485_v20  ;;  %v465_v24 = vmul.f32 %v1498_v60, %v1787_v48 }
 0x228   :  { %v522_v25 = vmax.f32 %v506_v41, 0.0  ;;  %v486_v26 = vmul.f32 %v1842_v63, %v464_v23 }
 0x229   :  { %v1500_v1 = vpop.eup %1499  ;;  %v523_v27 = vmax.f32 %v507_v42, 0.0  ;;  %v487_v28 = vmul.f32 %v1842_v63, %v465_v24 }
 0x22a   :  { %v1502_v29 = vpop.eup %1501  ;;  %1409 = vmatmul.mubr.msk.f32.gmra.mrb[14].mxu1 %vm261_vm1, %v522_v25  ;;  %v508_v13 = vadd.f32 %v1848_v7, %v486_v26  ;;  %v466_v53 = vmul.f32 %v1500_v1, %v1796_v3 }
 0x22b   :  { %1411 = vmatprep.mubr.msk.f32.mxu1 %vm261_vm1, %v523_v27  ;;  %v509_v30 = vadd.f32 %v1848_v7, %v487_v28  ;;  %v467_v48 = vmul.f32 %v1502_v29, %v1799_v52 }
 0x22c   :  { %v524_v33 = vmax.f32 %v508_v13, 0.0  ;;  %v488_v34 = vmul.f32 %v1842_v63, %v466_v53 }
 0x22d   :  { %v1504_v12 = vpop.eup %1503  ;;  %v525_v35 = vmax.f32 %v509_v30, 0.0  ;;  %v489_v36 = vmul.f32 %v1842_v63, %v467_v48 }
 0x22e   :  { %v1506_v37 = vpop.eup %1505  ;;  %1412 = vmatmul.mubr.msk.f32.gmra.mrb[16].mxu1 %vm261_vm1, %v524_v33  ;;  %v510_v38 = vadd.f32 %v1848_v7, %v488_v34  ;;  %v468_v3 = vmul.f32 %v1504_v12, %v1808_v14 }
 0x22f   :  { %1414 = vmatprep.mubr.msk.f32.mxu1 %vm261_vm1, %v525_v35  ;;  %v511_v39 = vadd.f32 %v1848_v7, %v489_v36  ;;  %v469_v52 = vmul.f32 %v1506_v37, %v1811_v56 }
 0x230   :  { %v526_v40 = vmax.f32 %v510_v38, 0.0  ;;  %v490_v43 = vmul.f32 %v1842_v63, %v468_v3 }
 0x231   :  { %v1508_v44 = vpop.eup %1507  ;;  %v527_v45 = vmax.f32 %v511_v39, 0.0  ;;  %v491_v46 = vmul.f32 %v1842_v63, %v469_v52 }
 0x232   :  { %1415 = vmatmul.mubr.msk.f32.gmra.mrb[18].mxu1 %vm261_vm1, %v526_v40  ;;  %v512_v47 = vadd.f32 %v1848_v7, %v490_v43  ;;  %v470_v21 = vmul.f32 %v1508_v44, %v1820_v62  ;;  %v1269_v62 = vld [vmem:[%s2299_s6] ss:$0 sm:$0xff] }
 0x233   :  { %1417 = vmatprep.mubr.msk.f32.mxu1 %vm261_vm1, %v527_v45  ;;  %v513_v14 = vadd.f32 %v1848_v7, %v491_v46 }
 0x234   :  { %v528_v50 = vmax.f32 %v512_v47, 0.0  ;;  %v492_v56 = vmul.f32 %v1842_v63, %v470_v21 }
 0x235   :  { %v529_v51 = vmax.f32 %v513_v14, 0.0 }
 0x236   :  { %1418 = vmatmul.mubr.msk.f32.gmra.mrb[20].mxu1 %vm261_vm1, %v528_v50  ;;  %v514_v49 = vadd.f32 %v1848_v7, %v492_v56 }
 0x237   :  { %1420 = vmatprep.mubr.msk.f32.mxu1 %vm261_vm1, %v529_v51 }
 0x238   :  { %v530_v55 = vmax.f32 %v514_v49, 0.0 }
 0x23a   :  { %1421 = vmatmul.mubr.msk.f32.gmra.mrb[22].mxu1 %vm261_vm1, %v530_v55 }
 0x2f1   :  { %v1401_v57 = vpop.f32.mrb[8].mxu1 }
 0x2f2   :  { %v1916_v22 = vadd.f32 %v1401_v57, %v1269_v62  ;;  %v656_v59 = vpop.f32.mrb[9].mxu1 }
 0x2f3   :  { %v1918_v61 = vadd.f32 %v1269_v62, %v656_v59 }
 0x2f4   :  { %v740_v63 = vsel %vm261_vm1, %v1916_v22, 0.0 }
 0x2f5   :  { %741 = vadd.xlane.f32.xlu1 %v740_v63  ;;  %v1404_v7 = vpop.f32.mrb[10].mxu1  ;;  %v737_v0 = vsel %vm261_vm1, %v1918_v61, 0.0 }
 0x2f6   :  { %v1924_v2 = vadd.f32 %v1404_v7, %v1269_v62  ;;  %738 = vadd.xlane.f32.xlu0 %v737_v0  ;;  %v666_v54 = vpop.f32.mrb[11].mxu1 }
 0x2f7   :  { %v1926_v4 = vadd.f32 %v1269_v62, %v666_v54 }
 0x2f8   :  { %v746_v5 = vsel %vm261_vm1, %v1924_v2, 0.0 }
 0x2f9   :  { %747 = vadd.xlane.f32.xlu1 %v746_v5  ;;  %v1407_v8 = vpop.f32.mrb[12].mxu1  ;;  %v743_v31 = vsel %vm261_vm1, %v1926_v4, 0.0 }
 0x2fa   :  { %v1932_v9 = vadd.f32 %v1407_v8, %v1269_v62  ;;  %744 = vadd.xlane.f32.xlu0 %v743_v31  ;;  %v676_v10 = vpop.f32.mrb[13].mxu1 }
 0x2fb   :  { %v1934_v32 = vadd.f32 %v1269_v62, %v676_v10 }
 0x2fc   :  { %v752_v11 = vsel %vm261_vm1, %v1932_v9, 0.0 }
 0x2fd   :  { %753 = vadd.xlane.f32.xlu1 %v752_v11  ;;  %v1410_v58 = vpop.f32.mrb[14].mxu1  ;;  %v749_v15 = vsel %vm261_vm1, %v1934_v32, 0.0 }
 0x2fe   :  { %v1940_v16 = vadd.f32 %v1410_v58, %v1269_v62  ;;  %750 = vadd.xlane.f32.xlu0 %v749_v15  ;;  %v686_v17 = vpop.f32.mrb[15].mxu1 }
 0x2ff   :  { %v1942_v18 = vadd.f32 %v1269_v62, %v686_v17 }
 0x300   :  { %v758_v19 = vsel %vm261_vm1, %v1940_v16, 0.0 }
 0x301   :  { %759 = vadd.xlane.f32.xlu1 %v758_v19  ;;  %v1413_v6 = vpop.f32.mrb[16].mxu1  ;;  %v755_v20 = vsel %vm261_vm1, %v1942_v18, 0.0 }
 0x302   :  { %v1948_v60 = vadd.f32 %v1413_v6, %v1269_v62  ;;  %756 = vadd.xlane.f32.xlu0 %v755_v20  ;;  %v696_v41 = vpop.f32.mrb[17].mxu1 }
 0x303   :  { %v1950_v23 = vadd.f32 %v1269_v62, %v696_v41 }
 0x304   :  { %v764_v42 = vsel %vm261_vm1, %v1948_v60, 0.0 }
 0x305   :  { %765 = vadd.xlane.f32.xlu1 %v764_v42  ;;  %v1416_v24 = vpop.f32.mrb[18].mxu1  ;;  %v761_v25 = vsel %vm261_vm1, %v1950_v23, 0.0 }
 0x306   :  { %v1956_v26 = vadd.f32 %v1416_v24, %v1269_v62  ;;  %762 = vadd.xlane.f32.xlu0 %v761_v25  ;;  %v706_v1 = vpop.f32.mrb[19].mxu1 }
 0x307   :  { %v1958_v27 = vadd.f32 %v1269_v62, %v706_v1 }
 0x308   :  { %v770_v28 = vsel %vm261_vm1, %v1956_v26, 0.0 }
 0x309   :  { %771 = vadd.xlane.f32.xlu1 %v770_v28  ;;  %v1419_v29 = vpop.f32.mrb[20].mxu1  ;;  %v767_v13 = vsel %vm261_vm1, %v1958_v27, 0.0 }
 0x30a   :  { %v1964_v53 = vadd.f32 %v1419_v29, %v1269_v62  ;;  %768 = vadd.xlane.f32.xlu0 %v767_v13  ;;  %v716_v30 = vpop.f32.mrb[21].mxu1 }
 0x30b   :  { %v1966_v48 = vadd.f32 %v1269_v62, %v716_v30 }
 0x30c   :  { %v776_v33 = vsel %vm261_vm1, %v1964_v53, 0.0 }
 0x30d   :  { %777 = vadd.xlane.f32.xlu1 %v776_v33  ;;  %v1422_v34 = vpop.f32.mrb[22].mxu1  ;;  %v773_v12 = vsel %vm261_vm1, %v1966_v48, 0.0 }
 0x30e   :  { %v1972_v35 = vadd.f32 %v1422_v34, %v1269_v62  ;;  %774 = vadd.xlane.f32.xlu0 %v773_v12  ;;  %v726_v36 = vpop.f32.mrb[23].mxu1 }
 0x30f   :  { %v1974_v37 = vadd.f32 %v1269_v62, %v726_v36 }
 0x310   :  { %v782_v38 = vsel %vm261_vm1, %v1972_v35, 0.0 }
 0x311   :  { %783 = vadd.xlane.f32.xlu1 %v782_v38  ;;  %v779_v3 = vsel %vm261_vm1, %v1974_v37, 0.0 }
 0x312   :  { %780 = vadd.xlane.f32.xlu0 %v779_v3 }
 0x382   :  { %v742_v39 = vpop.xlane.xlu1 %741 }
 0x383   :  { %v786_v52 = vmul.f32 0.03125, %v742_v39  ;;  %v739_v40 = vpop.xlane.xlu0 %738 }
 0x384   :  { %v785_v43 = vmul.f32 0.03125, %v739_v40 }
 0x385   :  { %v1981_v44 = vsub.f32 %v1916_v22, %v786_v52 }
 0x386   :  { %v1984_v45 = vsub.f32 %v1918_v61, %v785_v43  ;;  %v748_v46 = vpop.xlane.xlu1 %747 }
 0x387   :  { %v788_v47 = vmul.f32 0.03125, %v748_v46  ;;  %v745_v21 = vpop.xlane.xlu0 %744  ;;  %v818_v14 = vmul.f32 %v1981_v44, %v1981_v44 }
 0x388   :  { %v787_v50 = vmul.f32 0.03125, %v745_v21  ;;  %v817_v56 = vmul.f32 %v1984_v45, %v1984_v45 }
 0x389   :  { %v1991_v51 = vsub.f32 %v1924_v2, %v788_v47  ;;  %v836_v49 = vsel %vm261_vm1, %v818_v14, 0.0 }
 0x38a   :  { %v1995_v55 = vsub.f32 %v1926_v4, %v787_v50  ;;  %v754_v62 = vpop.xlane.xlu1 %753  ;;  %837 = vadd.xlane.f32.xlu1 %v836_v49  ;;  %v833_v57 = vsel %vm261_vm1, %v817_v56, 0.0 }
 0x38b   :  { %v790_v22 = vmul.f32 0.03125, %v754_v62  ;;  %834 = vadd.xlane.f32.xlu0 %v833_v57  ;;  %v751_v59 = vpop.xlane.xlu0 %750  ;;  %v820_v61 = vmul.f32 %v1991_v51, %v1991_v51 }
 0x38c   :  { %v789_v63 = vmul.f32 0.03125, %v751_v59  ;;  %v819_v7 = vmul.f32 %v1995_v55, %v1995_v55 }
 0x38d   :  { %v2003_v0 = vsub.f32 %v1932_v9, %v790_v22  ;;  %v842_v2 = vsel %vm261_vm1, %v820_v61, 0.0 }
 0x38e   :  { %v2007_v54 = vsub.f32 %v1934_v32, %v789_v63  ;;  %v760_v4 = vpop.xlane.xlu1 %759  ;;  %843 = vadd.xlane.f32.xlu1 %v842_v2  ;;  %v839_v5 = vsel %vm261_vm1, %v819_v7, 0.0  ;;  %v1022_v7 = vld [vmem:[%s2300_s9 + $0x8] sm:$0xff] }
 0x38f   :  { %v792_v8 = vmul.f32 0.03125, %v760_v4  ;;  %840 = vadd.xlane.f32.xlu0 %v839_v5  ;;  %v757_v31 = vpop.xlane.xlu0 %756  ;;  %v822_v10 = vmul.f32 %v2003_v0, %v2003_v0  ;;  %v1023_v4 = vld [vmem:[%s2300_s9 + $0x10] sm:$0xff]  ;;  %v1024_v5 = vld [vmem:[%s2300_s9 + $0x18] sm:$0xff] }
 0x390   :  { %v791_v11 = vmul.f32 0.03125, %v757_v31  ;;  %v821_v9 = vmul.f32 %v2007_v54, %v2007_v54 }
 0x391   :  { %v2015_v58 = vsub.f32 %v1940_v16, %v792_v8  ;;  %v848_v32 = vsel %vm261_vm1, %v822_v10, 0.0  ;;  %v1471_v8 = vpack.c.bf16 %v1024_v5, %v1023_v4 }
 0x392   :  { %v2019_v15 = vsub.f32 %v1942_v18, %v791_v11  ;;  %v766_v17 = vpop.xlane.xlu1 %765  ;;  %849 = vadd.xlane.f32.xlu1 %v848_v32  ;;  %v845_v19 = vsel %vm261_vm1, %v821_v9, 0.0 }
 0x393   :  { %v794_v6 = vmul.f32 0.03125, %v766_v17  ;;  %846 = vadd.xlane.f32.xlu0 %v845_v19  ;;  %v763_v20 = vpop.xlane.xlu0 %762  ;;  %v824_v41 = vmul.f32 %v2015_v58, %v2015_v58 }
 0x394   :  { %v793_v42 = vmul.f32 0.03125, %v763_v20  ;;  %v823_v16 = vmul.f32 %v2019_v15, %v2019_v15 }
 0x395   :  { %v2027_v24 = vsub.f32 %v1948_v60, %v794_v6  ;;  %v854_v18 = vsel %vm261_vm1, %v824_v41, 0.0 }
 0x396   :  { %v2031_v25 = vsub.f32 %v1950_v23, %v793_v42  ;;  %v772_v1 = vpop.xlane.xlu1 %771  ;;  %855 = vadd.xlane.f32.xlu1 %v854_v18  ;;  %v851_v28 = vsel %vm261_vm1, %v823_v16, 0.0 }
 0x397   :  { %v796_v29 = vmul.f32 0.03125, %v772_v1  ;;  %852 = vadd.xlane.f32.xlu0 %v851_v28  ;;  %v769_v13 = vpop.xlane.xlu0 %768  ;;  %v826_v30 = vmul.f32 %v2027_v24, %v2027_v24 }
 0x398   :  { %v795_v33 = vmul.f32 0.03125, %v769_v13  ;;  %v825_v60 = vmul.f32 %v2031_v25, %v2031_v25 }
 0x399   :  { %v2039_v34 = vsub.f32 %v1956_v26, %v796_v29  ;;  %v860_v23 = vsel %vm261_vm1, %v826_v30, 0.0 }
 0x39a   :  { %v2043_v12 = vsub.f32 %v1958_v27, %v795_v33  ;;  %v778_v36 = vpop.xlane.xlu1 %777  ;;  %861 = vadd.xlane.f32.xlu1 %v860_v23  ;;  %v857_v38 = vsel %vm261_vm1, %v825_v60, 0.0 }
 0x39b   :  { %v798_v3 = vmul.f32 0.03125, %v778_v36  ;;  %858 = vadd.xlane.f32.xlu0 %v857_v38  ;;  %v775_v39 = vpop.xlane.xlu0 %774  ;;  %v828_v52 = vmul.f32 %v2039_v34, %v2039_v34 }
 0x39c   :  { %v797_v40 = vmul.f32 0.03125, %v775_v39  ;;  %v827_v26 = vmul.f32 %v2043_v12, %v2043_v12 }
 0x39d   :  { %v2051_v43 = vsub.f32 %v1964_v53, %v798_v3  ;;  %v866_v27 = vsel %vm261_vm1, %v828_v52, 0.0  ;;  %v2091_v3 = vld [vmem:[%s2301_s7] ss:$0 sm:$0xff] }
 0x39e   :  { %v2055_v46 = vsub.f32 %v1966_v48, %v797_v40  ;;  %867 = vadd.xlane.f32.xlu1 %v866_v27  ;;  %v784_v47 = vpop.xlane.xlu1 %783  ;;  %v863_v21 = vsel %vm261_vm1, %v827_v26, 0.0 }
 0x39f   :  { %v800_v14 = vmul.f32 0.03125, %v784_v47  ;;  %864 = vadd.xlane.f32.xlu0 %v863_v21  ;;  %v781_v50 = vpop.xlane.xlu0 %780  ;;  %v830_v56 = vmul.f32 %v2051_v43, %v2051_v43  ;;  %v2097_v47 = vld [vmem:[%s2302_s8] ss:$0 sm:$0xff] }
 0x3a0   :  { %v799_v49 = vmul.f32 0.03125, %v781_v50  ;;  %v829_v53 = vmul.f32 %v2055_v46, %v2055_v46 }
 0x3a1   :  { %v2063_v62 = vsub.f32 %v1972_v35, %v800_v14  ;;  %v872_v48 = vsel %vm261_vm1, %v830_v56, 0.0 }
 0x3a2   :  { %v2067_v57 = vsub.f32 %v1974_v37, %v799_v49  ;;  %873 = vadd.xlane.f32.xlu1 %v872_v48  ;;  %v869_v22 = vsel %vm261_vm1, %v829_v53, 0.0  ;;  %v1021_v37 = vld [vmem:[%s2300_s9] sm:$0xff] }
 0x3a3   :  { %870 = vadd.xlane.f32.xlu0 %v869_v22  ;;  %v832_v59 = vmul.f32 %v2063_v62, %v2063_v62  ;;  %v1467_v2 = vpack.c.bf16 %v1022_v7, %v1021_v37 }
 0x3a4   :  { %v831_v61 = vmul.f32 %v2067_v57, %v2067_v57 }
 0x3a5   :  { %v878_v63 = vsel %vm261_vm1, %v832_v59, 0.0  ;;  %1468 = vmatprep.subr.bf16.mxu0 %v1467_v2 }
 0x3a6   :  { %879 = vadd.xlane.f32.xlu1 %v878_v63  ;;  %v875_v35 = vsel %vm261_vm1, %v831_v61, 0.0  ;;  %1470 = vmatpush3.bf16.msra.mxu0 %v1467_v2 }
 0x3a7   :  { %876 = vadd.xlane.f32.xlu0 %v875_v35  ;;  %1472 = vmatprep.subr.bf16.mxu0 %v1471_v8 }
 0x3aa   :  { %1474 = vmatpush3.bf16.msra.mxu0 %v1471_v8 }
 0x417   :  { %v838_v31 = vpop.xlane.xlu1 %837 }
 0x418   :  { %v882_v10 = vmul.f32 0.03125, %v838_v31  ;;  %v835_v11 = vpop.xlane.xlu0 %834 }
 0x419   :  { %v881_v9 = vmul.f32 0.03125, %v835_v11 }
 0x41a   :  { %v898_v32 = vadd.f32 1e-05, %v882_v10 }
 0x41b   :  { %v897_v17 = vadd.f32 1e-05, %v881_v9  ;;  %v844_v19 = vpop.xlane.xlu1 %843 }
 0x41c   :  { %1509 = vrsqrt.f32 %v898_v32  ;;  %v884_v6 = vmul.f32 0.03125, %v844_v19  ;;  %v841_v20 = vpop.xlane.xlu0 %840 }
 0x41d   :  { %1511 = vrsqrt.f32 %v897_v17  ;;  %v883_v41 = vmul.f32 0.03125, %v841_v20 }
 0x41e   :  { %v900_v42 = vadd.f32 1e-05, %v884_v6 }
 0x41f   :  { %v899_v16 = vadd.f32 1e-05, %v883_v41  ;;  %v850_v18 = vpop.xlane.xlu1 %849 }
 0x420   :  { %1513 = vrsqrt.f32 %v900_v42  ;;  %v886_v1 = vmul.f32 0.03125, %v850_v18  ;;  %v847_v28 = vpop.xlane.xlu0 %846 }
 0x421   :  { %1515 = vrsqrt.f32 %v899_v16  ;;  %v885_v29 = vmul.f32 0.03125, %v847_v28 }
 0x422   :  { %v902_v13 = vadd.f32 1e-05, %v886_v1 }
 0x423   :  { %v901_v30 = vadd.f32 1e-05, %v885_v29  ;;  %v856_v33 = vpop.xlane.xlu1 %855 }
 0x424   :  { %1517 = vrsqrt.f32 %v902_v13  ;;  %v888_v60 = vmul.f32 0.03125, %v856_v33  ;;  %v853_v23 = vpop.xlane.xlu0 %852 }
 0x425   :  { %1519 = vrsqrt.f32 %v901_v30  ;;  %v887_v36 = vmul.f32 0.03125, %v853_v23 }
 0x426   :  { %v1510_v38 = vpop.eup %1509  ;;  %v904_v39 = vadd.f32 1e-05, %v888_v60 }
 0x427   :  { %v1512_v52 = vpop.eup %1511  ;;  %v930_v40 = vmul.f32 %v1510_v38, %v1981_v44  ;;  %v903_v26 = vadd.f32 1e-05, %v887_v36  ;;  %v862_v27 = vpop.xlane.xlu1 %861 }
 0x428   :  { %1521 = vrsqrt.f32 %v904_v39  ;;  %v890_v21 = vmul.f32 0.03125, %v862_v27  ;;  %v859_v14 = vpop.xlane.xlu0 %858  ;;  %v929_v50 = vmul.f32 %v1512_v52, %v1984_v45 }
 0x429   :  { %v952_v56 = vmul.f32 %v2091_v3, %v930_v40  ;;  %1523 = vrsqrt.f32 %v903_v26  ;;  %v889_v49 = vmul.f32 0.03125, %v859_v14 }
 0x42a   :  { %v1514_v53 = vpop.eup %1513  ;;  %v906_v48 = vadd.f32 1e-05, %v890_v21  ;;  %v951_v44 = vmul.f32 %v2091_v3, %v929_v50 }
 0x42b   :  { %v1516_v22 = vpop.eup %1515  ;;  %v974_v59 = vadd.f32 %v2097_v47, %v952_v56  ;;  %v905_v61 = vadd.f32 1e-05, %v889_v49  ;;  %v868_v63 = vpop.xlane.xlu1 %867  ;;  %v932_v35 = vmul.f32 %v1514_v53, %v1991_v51 }
 0x42c   :  { %1525 = vrsqrt.f32 %v906_v48  ;;  %v892_v37 = vmul.f32 0.03125, %v868_v63  ;;  %v865_v7 = vpop.xlane.xlu0 %864  ;;  %v973_v45 = vadd.f32 %v2097_v47, %v951_v44  ;;  %v931_v2 = vmul.f32 %v1516_v22, %v1995_v55 }
 0x42d   :  { %v990_v4 = vmax.f32 %v974_v59, 0.0  ;;  %1527 = vrsqrt.f32 %v905_v61  ;;  %v891_v5 = vmul.f32 0.03125, %v865_v7  ;;  %v954_v8 = vmul.f32 %v2091_v3, %v932_v35 }
 0x42e   :  { %v1518_v31 = vpop.eup %1517  ;;  %v908_v10 = vadd.f32 1e-05, %v892_v37  ;;  %v989_v11 = vmax.f32 %v973_v45, 0.0  ;;  %v953_v9 = vmul.f32 %v2091_v3, %v931_v2 }
 0x42f   :  { %v1520_v32 = vpop.eup %1519  ;;  %1006 = vst.msk [vmem:[%s2303_s11 + $0x8] sm:$0xff] %vm261_vm1, %v990_v4  ;;  %v907_v51 = vadd.f32 1e-05, %v891_v5  ;;  %v874_v17 = vpop.xlane.xlu1 %873  ;;  %v976_v55 = vadd.f32 %v2097_v47, %v954_v8  ;;  %v934_v19 = vmul.f32 %v1518_v31, %v2003_v0 }
 0x430   :  { %1529 = vrsqrt.f32 %v908_v10  ;;  %v894_v6 = vmul.f32 0.03125, %v874_v17  ;;  %1005 = vst.msk [vmem:[%s2303_s11] sm:$0xff] %vm261_vm1, %v989_v11  ;;  %1431 = vmatprep.mubr.msk.f32.mxu0 %vm261_vm1, %v989_v11  ;;  %v871_v20 = vpop.xlane.xlu0 %870  ;;  %v975_v41 = vadd.f32 %v2097_v47, %v953_v9  ;;  %v933_v42 = vmul.f32 %v1520_v32, %v2007_v54 }
 0x431   :  { %1531 = vrsqrt.f32 %v907_v51  ;;  %v893_v16 = vmul.f32 0.03125, %v871_v20  ;;  %1432 = vmatmul.mubr.msk.f32.vlgmr.msra.gmra.mrb[8].mxu0 %vm261_vm1, %v990_v4  ;;  %v992_v18 = vmax.f32 %v976_v55, 0.0  ;;  %v956_v0 = vmul.f32 %v2091_v3, %v934_v19 }
 0x432   :  { %v1522_v1 = vpop.eup %1521  ;;  %v910_v28 = vadd.f32 1e-05, %v894_v6  ;;  %v991_v29 = vmax.f32 %v975_v41, 0.0  ;;  %v955_v13 = vmul.f32 %v2091_v3, %v933_v42 }
 0x433   :  { %v1524_v30 = vpop.eup %1523  ;;  %v909_v33 = vadd.f32 1e-05, %v893_v16  ;;  %v880_v60 = vpop.xlane.xlu1 %879  ;;  %1008 = vst.msk [vmem:[%s2303_s11 + $0x18] sm:$0xff] %vm261_vm1, %v992_v18  ;;  %v978_v54 = vadd.f32 %v2097_v47, %v956_v0  ;;  %v936_v23 = vmul.f32 %v1522_v1, %v2015_v58 }
 0x434   :  { %1533 = vrsqrt.f32 %v910_v28  ;;  %v896_v36 = vmul.f32 0.03125, %v880_v60  ;;  %1007 = vst.msk [vmem:[%s2303_s11 + $0x10] sm:$0xff] %vm261_vm1, %v991_v29  ;;  %1434 = vmatprep.mubr.msk.f32.mxu0 %vm261_vm1, %v991_v29  ;;  %v877_v38 = vpop.xlane.xlu0 %876  ;;  %v977_v39 = vadd.f32 %v2097_v47, %v955_v13  ;;  %v935_v52 = vmul.f32 %v1524_v30, %v2019_v15 }
 0x435   :  { %1535 = vrsqrt.f32 %v909_v33  ;;  %v895_v40 = vmul.f32 0.03125, %v877_v38  ;;  %1435 = vmatmul.mubr.msk.f32.gmra.mrb[10].mxu0 %vm261_vm1, %v992_v18  ;;  %v994_v26 = vmax.f32 %v978_v54, 0.0  ;;  %v958_v58 = vmul.f32 %v2091_v3, %v936_v23 }
 0x436   :  { %v1526_v27 = vpop.eup %1525  ;;  %v912_v21 = vadd.f32 1e-05, %v896_v36  ;;  %v993_v14 = vmax.f32 %v977_v39, 0.0  ;;  %v957_v50 = vmul.f32 %v2091_v3, %v935_v52 }
 0x437   :  { %v1528_v56 = vpop.eup %1527  ;;  %v911_v49 = vadd.f32 1e-05, %v895_v40  ;;  %1010 = vst.msk [vmem:[%s2303_s11 + $0x28] sm:$0xff] %vm261_vm1, %v994_v26  ;;  %v980_v15 = vadd.f32 %v2097_v47, %v958_v58  ;;  %v938_v53 = vmul.f32 %v1526_v27, %v2027_v24 }
 0x438   :  { %1537 = vrsqrt.f32 %v912_v21  ;;  %1009 = vst.msk [vmem:[%s2303_s11 + $0x20] sm:$0xff] %vm261_vm1, %v993_v14  ;;  %1437 = vmatprep.mubr.msk.f32.mxu0 %vm261_vm1, %v993_v14  ;;  %v979_v48 = vadd.f32 %v2097_v47, %v957_v50  ;;  %v937_v44 = vmul.f32 %v1528_v56, %v2031_v25 }
 0x439   :  { %1539 = vrsqrt.f32 %v911_v49  ;;  %1438 = vmatmul.mubr.msk.f32.gmra.mrb[12].mxu0 %vm261_vm1, %v994_v26  ;;  %v996_v22 = vmax.f32 %v980_v15, 0.0  ;;  %v960_v59 = vmul.f32 %v2091_v3, %v938_v53 }
 0x43a   :  { %v1530_v61 = vpop.eup %1529  ;;  %v995_v24 = vmax.f32 %v979_v48, 0.0  ;;  %v959_v63 = vmul.f32 %v2091_v3, %v937_v44 }
 0x43b   :  { %v1532_v35 = vpop.eup %1531  ;;  %1012 = vst.msk [vmem:[%s2303_s11 + $0x38] sm:$0xff] %vm261_vm1, %v996_v22  ;;  %v982_v37 = vadd.f32 %v2097_v47, %v960_v59  ;;  %v940_v25 = vmul.f32 %v1530_v61, %v2039_v34 }
 0x43c   :  { %1011 = vst.msk [vmem:[%s2303_s11 + $0x30] sm:$0xff] %vm261_vm1, %v995_v24  ;;  %1440 = vmatprep.mubr.msk.f32.mxu0 %vm261_vm1, %v995_v24  ;;  %v981_v7 = vadd.f32 %v2097_v47, %v959_v63  ;;  %v939_v45 = vmul.f32 %v1532_v35, %v2043_v12 }
 0x43d   :  { %1441 = vmatmul.mubr.msk.f32.gmra.mrb[14].mxu0 %vm261_vm1, %v996_v22  ;;  %v998_v2 = vmax.f32 %v982_v37, 0.0  ;;  %v962_v4 = vmul.f32 %v2091_v3, %v940_v25 }
 0x43e   :  { %v1534_v5 = vpop.eup %1533  ;;  %v997_v8 = vmax.f32 %v981_v7, 0.0  ;;  %v961_v34 = vmul.f32 %v2091_v3, %v939_v45 }
 0x43f   :  { %v1536_v31 = vpop.eup %1535  ;;  %1014 = vst.msk [vmem:[%s2303_s11 + $0x48] sm:$0xff] %vm261_vm1, %v998_v2  ;;  %v984_v10 = vadd.f32 %v2097_v47, %v962_v4  ;;  %v942_v11 = vmul.f32 %v1534_v5, %v2051_v43 }
 0x440   :  { %1013 = vst.msk [vmem:[%s2303_s11 + $0x40] sm:$0xff] %vm261_vm1, %v997_v8  ;;  %1443 = vmatprep.mubr.msk.f32.mxu0 %vm261_vm1, %v997_v8  ;;  %v983_v12 = vadd.f32 %v2097_v47, %v961_v34  ;;  %v941_v9 = vmul.f32 %v1536_v31, %v2055_v46 }
 0x441   :  { %1444 = vmatmul.mubr.msk.f32.gmra.mrb[16].mxu0 %vm261_vm1, %v998_v2  ;;  %v1000_v32 = vmax.f32 %v984_v10, 0.0  ;;  %v964_v51 = vmul.f32 %v2091_v3, %v942_v11 }
 0x442   :  { %v1538_v17 = vpop.eup %1537  ;;  %v999_v55 = vmax.f32 %v983_v12, 0.0  ;;  %v963_v43 = vmul.f32 %v2091_v3, %v941_v9 }
 0x443   :  { %v1540_v19 = vpop.eup %1539  ;;  %v944_v6 = vmul.f32 %v1538_v17, %v2063_v62  ;;  %1016 = vst.msk [vmem:[%s2303_s11 + $0x58] sm:$0xff] %vm261_vm1, %v1000_v32  ;;  %v986_v20 = vadd.f32 %v2097_v47, %v964_v51 }
 0x444   :  { %v943_v46 = vmul.f32 %v1540_v19, %v2067_v57  ;;  %1015 = vst.msk [vmem:[%s2303_s11 + $0x50] sm:$0xff] %vm261_vm1, %v999_v55  ;;  %1446 = vmatprep.mubr.msk.f32.mxu0 %vm261_vm1, %v999_v55  ;;  %v985_v41 = vadd.f32 %v2097_v47, %v963_v43 }
 0x445   :  { %1447 = vmatmul.mubr.msk.f32.gmra.mrb[18].mxu0 %vm261_vm1, %v1000_v32  ;;  %v1002_v62 = vmax.f32 %v986_v20, 0.0  ;;  %v966_v42 = vmul.f32 %v2091_v3, %v944_v6 }
 0x446   :  { %v1001_v16 = vmax.f32 %v985_v41, 0.0  ;;  %v965_v18 = vmul.f32 %v2091_v3, %v943_v46 }
 0x447   :  { %1018 = vst.msk [vmem:[%s2303_s11 + $0x68] sm:$0xff] %vm261_vm1, %v1002_v62  ;;  %v988_v57 = vadd.f32 %v2097_v47, %v966_v42 }
 0x448   :  { %1017 = vst.msk [vmem:[%s2303_s11 + $0x60] sm:$0xff] %vm261_vm1, %v1001_v16  ;;  %1449 = vmatprep.mubr.msk.f32.mxu0 %vm261_vm1, %v1001_v16  ;;  %v987_v0 = vadd.f32 %v2097_v47, %v965_v18  ;;  %v1288_v47 = vld [vmem:[%s2304_s10] ss:$0 sm:$0xff] }
 0x449   :  { %1450 = vmatmul.mubr.msk.f32.gmra.mrb[20].mxu0 %vm261_vm1, %v1002_v62  ;;  %v1004_v1 = vmax.f32 %v988_v57, 0.0 }
 0x44a   :  { %v1003_v3 = vmax.f32 %v987_v0, 0.0 }
 0x44b   :  { %1020 = vst.msk [vmem:[%s2303_s11 + $0x78] sm:$0xff] %vm261_vm1, %v1004_v1 }
 0x44c   :  { %1019 = vst.msk [vmem:[%s2303_s11 + $0x70] sm:$0xff] %vm261_vm1, %v1003_v3  ;;  %1452 = vmatprep.mubr.msk.f32.mxu0 %vm261_vm1, %v1003_v3 }
 0x44d   :  { %1453 = vmatmul.mubr.msk.f32.gmra.mrb[22].mxu0 %vm261_vm1, %v1004_v1 }
 0x504   :  { %v1433_v28 = vpop.f32.mrb[8].mxu0 }
 0x505   :  { %v1152_v29 = vadd.f32 %v1433_v28, %v1288_v47  ;;  %v1146_v13 = vpop.f32.mrb[9].mxu0 }
 0x506   :  { %v1147_v30 = vadd.f32 %v1288_v47, %v1146_v13 }
 0x507   :  { %1227 = vst.msk [vmem:[%s2305_s12 + $0x8] sm:$0xff] %vm1225_vm2, %v1152_v29 }
 0x508   :  { %1226 = vst.msk [vmem:[%s2305_s12] sm:$0xff] %vm1225_vm2, %v1147_v30  ;;  %v1436_v33 = vpop.f32.mrb[10].mxu0 }
 0x509   :  { %v1162_v60 = vadd.f32 %v1436_v33, %v1288_v47  ;;  %v1156_v54 = vpop.f32.mrb[11].mxu0 }
 0x50a   :  { %v1157_v23 = vadd.f32 %v1288_v47, %v1156_v54 }
 0x50b   :  { %1229 = vst.msk [vmem:[%s2305_s12 + $0x18] sm:$0xff] %vm1225_vm2, %v1162_v60 }
 0x50c   :  { %1228 = vst.msk [vmem:[%s2305_s12 + $0x10] sm:$0xff] %vm1225_vm2, %v1157_v23  ;;  %v1439_v36 = vpop.f32.mrb[12].mxu0 }
 0x50d   :  { %v1172_v38 = vadd.f32 %v1439_v36, %v1288_v47  ;;  %v1166_v39 = vpop.f32.mrb[13].mxu0 }
 0x50e   :  { %v1167_v52 = vadd.f32 %v1288_v47, %v1166_v39 }
 0x50f   :  { %1231 = vst.msk [vmem:[%s2305_s12 + $0x28] sm:$0xff] %vm1225_vm2, %v1172_v38 }
 0x510   :  { %1230 = vst.msk [vmem:[%s2305_s12 + $0x20] sm:$0xff] %vm1225_vm2, %v1167_v52  ;;  %v1442_v40 = vpop.f32.mrb[14].mxu0 }
 0x511   :  { %v1182_v26 = vadd.f32 %v1442_v40, %v1288_v47  ;;  %v1176_v58 = vpop.f32.mrb[15].mxu0 }
 0x512   :  { %v1177_v27 = vadd.f32 %v1288_v47, %v1176_v58 }
 0x513   :  { %1233 = vst.msk [vmem:[%s2305_s12 + $0x38] sm:$0xff] %vm1225_vm2, %v1182_v26 }
 0x514   :  { %1232 = vst.msk [vmem:[%s2305_s12 + $0x30] sm:$0xff] %vm1225_vm2, %v1177_v27  ;;  %v1445_v21 = vpop.f32.mrb[16].mxu0 }
 0x515   :  { %v1192_v14 = vadd.f32 %v1445_v21, %v1288_v47  ;;  %v1186_v50 = vpop.f32.mrb[17].mxu0 }
 0x516   :  { %v1187_v56 = vadd.f32 %v1288_v47, %v1186_v50 }
 0x517   :  { %1235 = vst.msk [vmem:[%s2305_s12 + $0x48] sm:$0xff] %vm1225_vm2, %v1192_v14 }
 0x518   :  { %1234 = vst.msk [vmem:[%s2305_s12 + $0x40] sm:$0xff] %vm1225_vm2, %v1187_v56  ;;  %v1448_v49 = vpop.f32.mrb[18].mxu0 }
 0x519   :  { %v1202_v15 = vadd.f32 %v1448_v49, %v1288_v47  ;;  %v1196_v53 = vpop.f32.mrb[19].mxu0 }
 0x51a   :  { %v1197_v48 = vadd.f32 %v1288_v47, %v1196_v53 }
 0x51b   :  { %1237 = vst.msk [vmem:[%s2305_s12 + $0x58] sm:$0xff] %vm1225_vm2, %v1202_v15 }
 0x51c   :  { %1236 = vst.msk [vmem:[%s2305_s12 + $0x50] sm:$0xff] %vm1225_vm2, %v1197_v48  ;;  %v1451_v44 = vpop.f32.mrb[20].mxu0 }
 0x51d   :  { %v1212_v22 = vadd.f32 %v1451_v44, %v1288_v47  ;;  %v1206_v59 = vpop.f32.mrb[21].mxu0 }
 0x51e   :  { %v1207_v61 = vadd.f32 %v1288_v47, %v1206_v59 }
 0x51f   :  { %1239 = vst.msk [vmem:[%s2305_s12 + $0x68] sm:$0xff] %vm1225_vm2, %v1212_v22 }
 0x520   :  { %1238 = vst.msk [vmem:[%s2305_s12 + $0x60] sm:$0xff] %vm1225_vm2, %v1207_v61  ;;  %v1454_v24 = vpop.f32.mrb[22].mxu0 }
 0x521   :  { %v1222_v63 = vadd.f32 %v1454_v24, %v1288_v47  ;;  %v1216_v35 = vpop.f32.mrb[23].mxu0 }
 0x522   :  { %v1217_v37 = vadd.f32 %v1288_v47, %v1216_v35 }
 0x523   :  { %1241 = vst.msk [vmem:[%s2305_s12 + $0x78] sm:$0xff] %vm1225_vm2, %v1222_v63 }
 0x524   :  { %1240 = vst.msk [vmem:[%s2305_s12 + $0x70] sm:$0xff] %vm1225_vm2, %v1217_v37 }

</bundles_post_ra>
